<compile_context>
chip_gen: v5e
topology: v5e:2x2
jax: 0.10.0
libtpu: 0.0.40
codegen_flags: <defaults>
</compile_context>

<pallas_src>
import jax
import jax.numpy as jnp
from jax import lax
from jax.experimental import pallas as pl
from jax.experimental.pallas import tpu as pltpu

_NEG_SLOPE = 0.01   # PyTorch LeakyReLU default
_EPS = 1e-5         # PyTorch BatchNorm1d default


def _vmem_limits():
    """(scoped-vmem limit to request, tile byte budget), generation-aware."""
    try:
        cap = int(pltpu.get_tpu_info().vmem_capacity_bytes)
    except Exception:
        cap = 64 << 20                        # conservative: v7x per-TensorCore
    cap = max(cap, 32 << 20)
    limit = min(int(cap * 0.8), 112 << 20)    # headroom for compiler scratch
    budget = int(limit * 0.6)                 # what the tiling math may consume
    return limit, budget


def _pick_tiles(N, Cin, Cout, L, itemsize, budget, max_tl):
    """Pick (NB, TL, Lp): batch block, length tile, padded length."""
    col_bytes = (Cin + Cout) * itemsize       # bytes moved per (item, lane) in pass 2
    if L <= 256:
        tl = L                                # full row (== full dim is legal)
    else:
        fit = max(128, (budget // (2 * col_bytes)) // 128 * 128)
        tl = int(min(fit, max_tl, pl.cdiv(L, 128) * 128))
    lp = int(pl.cdiv(L, tl) * tl)
    # Block over the batch so each grid step moves >= ~2 MiB when shapes are small.
    per_item = tl * col_bytes
    nb = 1
    for cand in range(1, min(N, 4) + 1):
        if N % cand == 0:
            nb = cand
            if cand * per_item >= (2 << 20):
                break
    return nb, tl, lp


def _make_stats_kernel(TL, LN, L_true, needs_mask):
    nchunks = TL // LN

    def kernel(x_ref, w_ref, b_ref, stats_ref, sum_sc, sq_sc):
        t = pl.program_id(1)

        @pl.when(t == 0)
        def _():
            sum_sc[...] = jnp.zeros_like(sum_sc)
            sq_sc[...] = jnp.zeros_like(sq_sc)

        w = w_ref[...]
        b = b_ref[...].astype(jnp.float32)            # (Cout, 1)
        for n in range(x_ref.shape[0]):               # static NB-unrolled loop
            y = jnp.dot(w, x_ref[n], preferred_element_type=jnp.float32) + b
            y = jnp.where(y > 0, y, _NEG_SLOPE * y)   # LeakyReLU
            if needs_mask:
                lane = lax.broadcasted_iota(jnp.int32, y.shape, 1)
                y = jnp.where(t * TL + lane < L_true, y, 0.0)
            # Lane-dense VPU accumulation: no XLU reduce / narrow store per step.
            for c in range(nchunks):
                blk = y[:, c * LN:(c + 1) * LN]
                sum_sc[...] += blk
                sq_sc[...] += blk * blk

        @pl.when(t == pl.num_programs(1) - 1)
        def _():
            stats_ref[0, :, 0:1] = jnp.sum(sum_sc[...], axis=1, keepdims=True)
            stats_ref[0, :, 1:2] = jnp.sum(sq_sc[...], axis=1, keepdims=True)

    return kernel


def _norm_kernel(x_ref, w_ref, p_ref, o_ref):
    # Recompute y (K = Cin is tiny) and apply the fused BN affine (one FMA/elem).
    # TODO(synk): when Cin >= ~2*Cout, storing bf16 y in pass 1 and making this a
    # pure affine pass would move fewer HBM bytes; recompute path kept for now.
    w = w_ref[...]
    b = p_ref[:, 0:1]
    scale = p_ref[:, 1:2]
    shift = p_ref[:, 2:3]
    for n in range(x_ref.shape[0]):                   # static NB-unrolled loop
        y = jnp.dot(w, x_ref[n], preferred_element_type=jnp.float32) + b
        y = jnp.where(y > 0, y, _NEG_SLOPE * y)
        o_ref[n] = (y * scale + shift).astype(o_ref.dtype)


def conv_block_forward(x_ncl, weight, bias, gamma, beta, *, max_tl=8192):
    """Conv1d(k=1) -> LeakyReLU -> BatchNorm1d (training-mode batch statistics).

    x_ncl: (N, Cin, L).  weight: (Cout, Cin).  Returns (N, Cout, L).
    """
    N, Cin, L = x_ncl.shape
    Cout = weight.shape[0]
    M = N * L

    # bf16 inputs keep bf16 HBM traffic (and produce bf16 output); otherwise f32.
    cdt = jnp.bfloat16 if x_ncl.dtype == jnp.bfloat16 else jnp.float32
    itemsize = jnp.dtype(cdt).itemsize

    vmem_limit, budget = _vmem_limits()
    NB, TL, Lp = _pick_tiles(N, Cin, Cout, L, itemsize, budget, max_tl)
    LN = 128 if TL % 128 == 0 else TL          # lane width of the stats scratch
    grid = (N // NB, Lp // TL)

    x = x_ncl.astype(cdt)
    if Lp != L:
        x = jnp.pad(x, ((0, 0), (0, 0), (0, Lp - L)))
    w = weight.astype(cdt)
    b = bias.reshape(Cout, 1).astype(jnp.float32)

    x_spec = pl.BlockSpec((NB, Cin, TL), lambda n, t: (n, 0, t))
    w_spec = pl.BlockSpec((Cout, Cin), lambda n, t: (0, 0))

    # ---- pass 1: per-channel sum / sum-of-squares of LeakyReLU(conv(x)) ----
    stats = pl.pallas_call(
        _make_stats_kernel(TL, LN, L, needs_mask=(Lp != L)),
        out_shape=jax.ShapeDtypeStruct((N // NB, Cout, 2), jnp.float32),
        grid=grid,
        in_specs=[x_spec, w_spec, pl.BlockSpec((Cout, 1), lambda n, t: (0, 0))],
        out_specs=pl.BlockSpec((1, Cout, 2), lambda n, t: (n, 0, 0)),
        scratch_shapes=[pltpu.VMEM((Cout, LN), jnp.float32),
                        pltpu.VMEM((Cout, LN), jnp.float32)],
        compiler_params=pltpu.CompilerParams(
            dimension_semantics=("parallel", "arbitrary"),
            vmem_limit_bytes=vmem_limit),
        cost_estimate=pl.CostEstimate(
            flops=2 * M * Cin * Cout + 4 * M * Cout,
            transcendentals=0,
            bytes_accessed=itemsize * M * Cin + 8 * (N // NB) * Cout),
    )(x, w, b)

    # Finalize the BN affine once per channel (tiny, fused by XLA).
    # TODO(synk): E[y^2]-E[y]^2 in f32 can lose precision for very large N*L;
    # a Welford-style merge of the per-batch-block partials would be sturdier.
    s = jnp.sum(stats[:, :, 0], axis=0)
    q = jnp.sum(stats[:, :, 1], axis=0)
    mean = s / M
    var = jnp.maximum(q / M - mean * mean, 0.0)        # biased batch variance
    scale = gamma.astype(jnp.float32) * lax.rsqrt(var + _EPS)
    shift = beta.astype(jnp.float32) - mean * scale
    params = jnp.stack([bias.astype(jnp.float32), scale, shift], axis=1)  # (Cout,3)

    # ---- pass 2: recompute y tile-wise, apply fused affine, write NCL out ----
    out = pl.pallas_call(
        _norm_kernel,
        out_shape=jax.ShapeDtypeStruct((N, Cout, Lp), cdt),
        grid=grid,
        in_specs=[x_spec, w_spec, pl.BlockSpec((Cout, 3), lambda n, t: (0, 0))],
        out_specs=pl.BlockSpec((NB, Cout, TL), lambda n, t: (n, 0, t)),
        compiler_params=pltpu.CompilerParams(
            dimension_semantics=("parallel", "parallel"),
            vmem_limit_bytes=vmem_limit),
        cost_estimate=pl.CostEstimate(
            flops=2 * M * Cin * Cout + 4 * M * Cout,
            transcendentals=0,
            bytes_accessed=itemsize * M * (Cin + Cout)),
    )(x, w, params)

    if Lp != L:
        out = out[:, :, :L]
    return out


def _reference(x, weight, bias, gamma, beta):
    xf = x.astype(jnp.float32)
    y = jnp.einsum("oi,nil->nol", weight, xf) + bias[None, :, None]
    y = jnp.where(y > 0, y, _NEG_SLOPE * y)
    m = jnp.mean(y, axis=(0, 2), keepdims=True)
    v = jnp.mean((y - m) ** 2, axis=(0, 2), keepdims=True)
    return ((y - m) * lax.rsqrt(v + _EPS) * gamma[None, :, None]
            + beta[None, :, None])


if __name__ == "__main__":
    fwd = jax.jit(conv_block_forward, static_argnames=("max_tl",))

    def run_case(N, Cin, Cout, L, max_tl=8192, dtype=jnp.float32, tol=1e-4):
        key = jax.random.PRNGKey(0)
        k_x, k_w, k_b = jax.random.split(key, 3)
        x = jax.random.normal(k_x, (N, Cin, L), dtype=jnp.float32).astype(dtype)
        bound = 1.0 / (Cin ** 0.5)                       # Conv1d-style init
        weight = jax.random.uniform(k_w, (Cout, Cin), jnp.float32, -bound, bound)
        bias = jax.random.uniform(k_b, (Cout,), jnp.float32, -bound, bound)
        gamma = jnp.ones((Cout,), jnp.float32)           # BatchNorm1d defaults
        beta = jnp.zeros((Cout,), jnp.float32)

        out = fwd(x, weight, bias, gamma, beta, max_tl=max_tl)
        jax.block_until_ready(out)
        assert out.shape == (N, Cout, L)

        ref = _reference(x, weight, bias, gamma, beta)
        assert jnp.allclose(out.astype(jnp.float32), ref, atol=tol, rtol=tol), \
            (N, Cin, Cout, L, str(dtype))

    # Small canonical case (typical tiny Conv_Block shapes).
    run_case(N=2, Cin=4, Cout=8, L=16)
    # Padding + masking + multi-tile reduction + batch-blocking path.
    run_case(N=3, Cin=5, Cout=7, L=300, max_tl=128)
    # bf16 I/O path (bf16 HBM traffic, f32 post-dot math, bf16 output).
    run_case(N=2, Cin=4, Cout=8, L=16, dtype=jnp.bfloat16, tol=5e-2)

    print("KERNEL_OK")
</pallas_src>

<mosaic_0001>
module attributes {stable_mosaic.version = 11 : i64} {
  func.func @kernel(%arg0: i32, %arg1: i32, %arg2: memref<2x4x16xf32, #tpu.memory_space<vmem>>, %arg3: memref<8x4xf32, #tpu.memory_space<vmem>>, %arg4: memref<8x1xf32, #tpu.memory_space<vmem>>, %arg5: memref<1x8x2xf32, #tpu.memory_space<vmem>>, %arg6: memref<8x16xf32, #tpu.memory_space<vmem>>, %arg7: memref<8x16xf32, #tpu.memory_space<vmem>>) attributes {dimension_semantics = [#tpu.dimension_semantics<parallel>, #tpu.dimension_semantics<arbitrary>], iteration_bounds = array<i64: 1, 1>, scalar_prefetch = 0 : i64, scratch_operands = 2 : i64, tpu.core_type = #tpu.core_type<tc>, window_params = [{transform_indices = @transform_0, window_bounds = array<i64: 2, 4, 16>}, {pipeline_mode = #tpu.pipeline_mode<synchronous>, transform_indices = @transform_1, window_bounds = array<i64: 8, 4>}, {pipeline_mode = #tpu.pipeline_mode<synchronous>, transform_indices = @transform_2, window_bounds = array<i64: 8, 1>}, {transform_indices = @transform_3, window_bounds = array<i64: 1, 8, 2>}]} {
    %c0_i32 = arith.constant 0 : i32
    %0 = arith.cmpi eq, %arg1, %c0_i32 : i32
    %1 = arith.extui %0 : i1 to i32
    %c0_i32_0 = arith.constant 0 : i32
    %2 = arith.cmpi ne, %1, %c0_i32_0 : i32
    scf.if %2 {
      %cst_32 = arith.constant 0.000000e+00 : f32
      %42 = vector.broadcast %cst_32 : f32 to vector<8x16xf32>
      %c0_33 = arith.constant 0 : index
      %c0_34 = arith.constant 0 : index
      %43 = vector.load %arg6[%c0_33, %c0_34] : memref<8x16xf32, #tpu.memory_space<vmem>>, vector<8x16xf32>
      tpu.vector_store %arg6[%c0_33, %c0_34], %42 {strides = array<i32>} : memref<8x16xf32, #tpu.memory_space<vmem>>, vector<8x16xf32>,
      %cst_35 = arith.constant 0.000000e+00 : f32
      %44 = vector.broadcast %cst_35 : f32 to vector<8x16xf32>
      %c0_36 = arith.constant 0 : index
      %c0_37 = arith.constant 0 : index
      %45 = vector.load %arg7[%c0_36, %c0_37] : memref<8x16xf32, #tpu.memory_space<vmem>>, vector<8x16xf32>
      tpu.vector_store %arg7[%c0_36, %c0_37], %44 {strides = array<i32>} : memref<8x16xf32, #tpu.memory_space<vmem>>, vector<8x16xf32>,
    } else {
    }
    %c0 = arith.constant 0 : index
    %c0_1 = arith.constant 0 : index
    %3 = vector.load %arg3[%c0, %c0_1] : memref<8x4xf32, #tpu.memory_space<vmem>>, vector<8x4xf32>
    %c0_2 = arith.constant 0 : index
    %c0_3 = arith.constant 0 : index
    %4 = vector.load %arg4[%c0_2, %c0_3] : memref<8x1xf32, #tpu.memory_space<vmem>>, vector<8x1xf32>
    %c0_4 = arith.constant 0 : index
    %c0_5 = arith.constant 0 : index
    %c0_6 = arith.constant 0 : index
    %5 = vector.load %arg2[%c0_4, %c0_5, %c0_6] : memref<2x4x16xf32, #tpu.memory_space<vmem>>, vector<1x4x16xf32>
    %6 = vector.shape_cast %5 : vector<1x4x16xf32> to vector<4x16xf32>
    %cst = arith.constant dense<0.000000e+00> : vector<8x16xf32>
    %7 = tpu.matmul %3, %6, %cst {dimension_numbers = #tpu.dot_dimension_numbers<[1], [0], [0], [1], [0, 0, 1, 1], [], []>} : vector<8x4xf32>, vector<4x16xf32>, vector<8x16xf32> -> vector<8x16xf32>
    %8 = vector.broadcast %4 : vector<8x1xf32> to vector<8x16xf32>
    %9 = arith.addf %7, %8 : vector<8x16xf32>
    %cst_7 = arith.constant 0.000000e+00 : f32
    %10 = vector.broadcast %cst_7 : f32 to vector<8x16xf32>
    %11 = arith.cmpf ogt, %9, %10 : vector<8x16xf32>
    %cst_8 = arith.constant 0.00999999977 : f32
    %12 = vector.broadcast %cst_8 : f32 to vector<8x16xf32>
    %13 = arith.mulf %12, %9 : vector<8x16xf32>
    %14 = arith.select %11, %9, %13 : vector<8x16xi1>, vector<8x16xf32>
    %c0_9 = arith.constant 0 : index
    %c0_10 = arith.constant 0 : index
    %15 = vector.load %arg6[%c0_9, %c0_10] : memref<8x16xf32, #tpu.memory_space<vmem>>, vector<8x16xf32>
    %16 = arith.addf %15, %14 : vector<8x16xf32>
    %c0_11 = arith.constant 0 : index
    %c0_12 = arith.constant 0 : index
    %17 = vector.load %arg6[%c0_11, %c0_12] : memref<8x16xf32, #tpu.memory_space<vmem>>, vector<8x16xf32>
    tpu.vector_store %arg6[%c0_11, %c0_12], %16 {strides = array<i32>} : memref<8x16xf32, #tpu.memory_space<vmem>>, vector<8x16xf32>,
    %c0_13 = arith.constant 0 : index
    %c0_14 = arith.constant 0 : index
    %18 = vector.load %arg7[%c0_13, %c0_14] : memref<8x16xf32, #tpu.memory_space<vmem>>, vector<8x16xf32>
    %19 = arith.mulf %14, %14 : vector<8x16xf32>
    %20 = arith.addf %18, %19 : vector<8x16xf32>
    %c0_15 = arith.constant 0 : index
    %c0_16 = arith.constant 0 : index
    %21 = vector.load %arg7[%c0_15, %c0_16] : memref<8x16xf32, #tpu.memory_space<vmem>>, vector<8x16xf32>
    tpu.vector_store %arg7[%c0_15, %c0_16], %20 {strides = array<i32>} : memref<8x16xf32, #tpu.memory_space<vmem>>, vector<8x16xf32>,
    %c1 = arith.constant 1 : index
    %c0_17 = arith.constant 0 : index
    %c0_18 = arith.constant 0 : index
    %22 = vector.load %arg2[%c1, %c0_17, %c0_18] : memref<2x4x16xf32, #tpu.memory_space<vmem>>, vector<1x4x16xf32>
    %23 = vector.shape_cast %22 : vector<1x4x16xf32> to vector<4x16xf32>
    %cst_19 = arith.constant dense<0.000000e+00> : vector<8x16xf32>
    %24 = tpu.matmul %3, %23, %cst_19 {dimension_numbers = #tpu.dot_dimension_numbers<[1], [0], [0], [1], [0, 0, 1, 1], [], []>} : vector<8x4xf32>, vector<4x16xf32>, vector<8x16xf32> -> vector<8x16xf32>
    %25 = vector.broadcast %4 : vector<8x1xf32> to vector<8x16xf32>
    %26 = arith.addf %24, %25 : vector<8x16xf32>
    %cst_20 = arith.constant 0.000000e+00 : f32
    %27 = vector.broadcast %cst_20 : f32 to vector<8x16xf32>
    %28 = arith.cmpf ogt, %26, %27 : vector<8x16xf32>
    %cst_21 = arith.constant 0.00999999977 : f32
    %29 = vector.broadcast %cst_21 : f32 to vector<8x16xf32>
    %30 = arith.mulf %29, %26 : vector<8x16xf32>
    %31 = arith.select %28, %26, %30 : vector<8x16xi1>, vector<8x16xf32>
    %c0_22 = arith.constant 0 : index
    %c0_23 = arith.constant 0 : index
    %32 = vector.load %arg6[%c0_22, %c0_23] : memref<8x16xf32, #tpu.memory_space<vmem>>, vector<8x16xf32>
    %33 = arith.addf %32, %31 : vector<8x16xf32>
    %c0_24 = arith.constant 0 : index
    %c0_25 = arith.constant 0 : index
    %34 = vector.load %arg6[%c0_24, %c0_25] : memref<8x16xf32, #tpu.memory_space<vmem>>, vector<8x16xf32>
    tpu.vector_store %arg6[%c0_24, %c0_25], %33 {strides = array<i32>} : memref<8x16xf32, #tpu.memory_space<vmem>>, vector<8x16xf32>,
    %c0_26 = arith.constant 0 : index
    %c0_27 = arith.constant 0 : index
    %35 = vector.load %arg7[%c0_26, %c0_27] : memref<8x16xf32, #tpu.memory_space<vmem>>, vector<8x16xf32>
    %36 = arith.mulf %31, %31 : vector<8x16xf32>
    %37 = arith.addf %35, %36 : vector<8x16xf32>
    %c0_28 = arith.constant 0 : index
    %c0_29 = arith.constant 0 : index
    %38 = vector.load %arg7[%c0_28, %c0_29] : memref<8x16xf32, #tpu.memory_space<vmem>>, vector<8x16xf32>
    tpu.vector_store %arg7[%c0_28, %c0_29], %37 {strides = array<i32>} : memref<8x16xf32, #tpu.memory_space<vmem>>, vector<8x16xf32>,
    %c0_i32_30 = arith.constant 0 : i32
    %39 = arith.cmpi eq, %arg1, %c0_i32_30 : i32
    %40 = arith.extui %39 : i1 to i32
    %c0_i32_31 = arith.constant 0 : i32
    %41 = arith.cmpi ne, %40, %c0_i32_31 : i32
    scf.if %41 {
      %c0_32 = arith.constant 0 : index
      %c0_33 = arith.constant 0 : index
      %42 = vector.load %arg6[%c0_32, %c0_33] : memref<8x16xf32, #tpu.memory_space<vmem>>, vector<8x16xf32>
      %cst_34 = arith.constant dense<0.000000e+00> : vector<8xf32>
      %43 = vector.multi_reduction <add>, %42, %cst_34 [1] : vector<8x16xf32> to vector<8xf32>
      %44 = vector.shape_cast %43 : vector<8xf32> to vector<8x1xf32>
      %c0_35 = arith.constant 0 : index
      %c0_36 = arith.constant 0 : index
      %c0_37 = arith.constant 0 : index
      %45 = vector.load %arg5[%c0_35, %c0_36, %c0_37] : memref<1x8x2xf32, #tpu.memory_space<vmem>>, vector<1x8x1xf32>
      %46 = vector.shape_cast %45 : vector<1x8x1xf32> to vector<8x1xf32>
      %47 = vector.shape_cast %44 : vector<8x1xf32> to vector<1x8x1xf32>
      tpu.vector_store %arg5[%c0_35, %c0_36, %c0_37], %47 {strides = array<i32>} : memref<1x8x2xf32, #tpu.memory_space<vmem>>, vector<1x8x1xf32>,
      %c0_38 = arith.constant 0 : index
      %c0_39 = arith.constant 0 : index
      %48 = vector.load %arg7[%c0_38, %c0_39] : memref<8x16xf32, #tpu.memory_space<vmem>>, vector<8x16xf32>
      %cst_40 = arith.constant dense<0.000000e+00> : vector<8xf32>
      %49 = vector.multi_reduction <add>, %48, %cst_40 [1] : vector<8x16xf32> to vector<8xf32>
      %50 = vector.shape_cast %49 : vector<8xf32> to vector<8x1xf32>
      %c0_41 = arith.constant 0 : index
      %c0_42 = arith.constant 0 : index
      %c1_43 = arith.constant 1 : index
      %51 = vector.load %arg5[%c0_41, %c0_42, %c1_43] : memref<1x8x2xf32, #tpu.memory_space<vmem>>, vector<1x8x1xf32>
      %52 = vector.shape_cast %51 : vector<1x8x1xf32> to vector<8x1xf32>
      %53 = vector.shape_cast %50 : vector<8x1xf32> to vector<1x8x1xf32>
      tpu.vector_store %arg5[%c0_41, %c0_42, %c1_43], %53 {strides = array<i32>} : memref<1x8x2xf32, #tpu.memory_space<vmem>>, vector<1x8x1xf32>,
    } else {
    }
    return
  }
  func.func @transform_0(%arg0: i32, %arg1: i32) -> (i32, i32, i32) {
    %c0_i32 = arith.constant 0 : i32
    %c0_i32_0 = arith.constant 0 : i32
    return %arg0, %c0_i32, %arg1 : i32, i32, i32
  }
  func.func @transform_1(%arg0: i32, %arg1: i32) -> (i32, i32) {
    %c0_i32 = arith.constant 0 : i32
    %c0_i32_0 = arith.constant 0 : i32
    %c0_i32_1 = arith.constant 0 : i32
    return %c0_i32, %c0_i32_0 : i32, i32
  }
  func.func @transform_2(%arg0: i32, %arg1: i32) -> (i32, i32) {
    %c0_i32 = arith.constant 0 : i32
    %c0_i32_0 = arith.constant 0 : i32
    %c0_i32_1 = arith.constant 0 : i32
    return %c0_i32, %c0_i32_0 : i32, i32
  }
  func.func @transform_3(%arg0: i32, %arg1: i32) -> (i32, i32, i32) {
    %c0_i32 = arith.constant 0 : i32
    %c0_i32_0 = arith.constant 0 : i32
    %c0_i32_1 = arith.constant 0 : i32
    return %arg0, %c0_i32, %c0_i32_0 : i32, i32, i32
  }
}

module attributes {stable_mosaic.version = 11 : i64} {
  func.func @_norm_kernel(%arg0: i32, %arg1: i32, %arg2: memref<2x4x16xf32, #tpu.memory_space<vmem>>, %arg3: memref<8x4xf32, #tpu.memory_space<vmem>>, %arg4: memref<8x3xf32, #tpu.memory_space<vmem>>, %arg5: memref<2x8x16xf32, #tpu.memory_space<vmem>>) attributes {dimension_semantics = [#tpu.dimension_semantics<parallel>, #tpu.dimension_semantics<parallel>], iteration_bounds = array<i64: 1, 1>, scalar_prefetch = 0 : i64, scratch_operands = 0 : i64, tpu.core_type = #tpu.core_type<tc>, window_params = [{transform_indices = @transform_0, window_bounds = array<i64: 2, 4, 16>}, {pipeline_mode = #tpu.pipeline_mode<synchronous>, transform_indices = @transform_1, window_bounds = array<i64: 8, 4>}, {pipeline_mode = #tpu.pipeline_mode<synchronous>, transform_indices = @transform_2, window_bounds = array<i64: 8, 3>}, {transform_indices = @transform_3, window_bounds = array<i64: 2, 8, 16>}]} {
    %c0 = arith.constant 0 : index
    %c0_0 = arith.constant 0 : index
    %0 = vector.load %arg3[%c0, %c0_0] : memref<8x4xf32, #tpu.memory_space<vmem>>, vector<8x4xf32>
    %c0_1 = arith.constant 0 : index
    %c0_2 = arith.constant 0 : index
    %1 = vector.load %arg4[%c0_1, %c0_2] : memref<8x3xf32, #tpu.memory_space<vmem>>, vector<8x1xf32>
    %c0_3 = arith.constant 0 : index
    %c1 = arith.constant 1 : index
    %2 = vector.load %arg4[%c0_3, %c1] : memref<8x3xf32, #tpu.memory_space<vmem>>, vector<8x1xf32>
    %c0_4 = arith.constant 0 : index
    %c2 = arith.constant 2 : index
    %3 = vector.load %arg4[%c0_4, %c2] : memref<8x3xf32, #tpu.memory_space<vmem>>, vector<8x1xf32>
    %c0_5 = arith.constant 0 : index
    %c0_6 = arith.constant 0 : index
    %c0_7 = arith.constant 0 : index
    %4 = vector.load %arg2[%c0_5, %c0_6, %c0_7] : memref<2x4x16xf32, #tpu.memory_space<vmem>>, vector<1x4x16xf32>
    %5 = vector.shape_cast %4 : vector<1x4x16xf32> to vector<4x16xf32>
    %cst = arith.constant dense<0.000000e+00> : vector<8x16xf32>
    %6 = tpu.matmul %0, %5, %cst {dimension_numbers = #tpu.dot_dimension_numbers<[1], [0], [0], [1], [0, 0, 1, 1], [], []>} : vector<8x4xf32>, vector<4x16xf32>, vector<8x16xf32> -> vector<8x16xf32>
    %7 = vector.broadcast %1 : vector<8x1xf32> to vector<8x16xf32>
    %8 = arith.addf %6, %7 : vector<8x16xf32>
    %cst_8 = arith.constant 0.000000e+00 : f32
    %9 = vector.broadcast %cst_8 : f32 to vector<8x16xf32>
    %10 = arith.cmpf ogt, %8, %9 : vector<8x16xf32>
    %cst_9 = arith.constant 0.00999999977 : f32
    %11 = vector.broadcast %cst_9 : f32 to vector<8x16xf32>
    %12 = arith.mulf %11, %8 : vector<8x16xf32>
    %13 = arith.select %10, %8, %12 : vector<8x16xi1>, vector<8x16xf32>
    %14 = vector.broadcast %2 : vector<8x1xf32> to vector<8x16xf32>
    %15 = arith.mulf %13, %14 : vector<8x16xf32>
    %16 = vector.broadcast %3 : vector<8x1xf32> to vector<8x16xf32>
    %17 = arith.addf %15, %16 : vector<8x16xf32>
    %c0_10 = arith.constant 0 : index
    %c0_11 = arith.constant 0 : index
    %c0_12 = arith.constant 0 : index
    %18 = vector.load %arg5[%c0_10, %c0_11, %c0_12] : memref<2x8x16xf32, #tpu.memory_space<vmem>>, vector<1x8x16xf32>
    %19 = vector.shape_cast %18 : vector<1x8x16xf32> to vector<8x16xf32>
    %20 = vector.shape_cast %17 : vector<8x16xf32> to vector<1x8x16xf32>
    tpu.vector_store %arg5[%c0_10, %c0_11, %c0_12], %20 {strides = array<i32>} : memref<2x8x16xf32, #tpu.memory_space<vmem>>, vector<1x8x16xf32>,
    %c1_13 = arith.constant 1 : index
    %c0_14 = arith.constant 0 : index
    %c0_15 = arith.constant 0 : index
    %21 = vector.load %arg2[%c1_13, %c0_14, %c0_15] : memref<2x4x16xf32, #tpu.memory_space<vmem>>, vector<1x4x16xf32>
    %22 = vector.shape_cast %21 : vector<1x4x16xf32> to vector<4x16xf32>
    %cst_16 = arith.constant dense<0.000000e+00> : vector<8x16xf32>
    %23 = tpu.matmul %0, %22, %cst_16 {dimension_numbers = #tpu.dot_dimension_numbers<[1], [0], [0], [1], [0, 0, 1, 1], [], []>} : vector<8x4xf32>, vector<4x16xf32>, vector<8x16xf32> -> vector<8x16xf32>
    %24 = vector.broadcast %1 : vector<8x1xf32> to vector<8x16xf32>
    %25 = arith.addf %23, %24 : vector<8x16xf32>
    %cst_17 = arith.constant 0.000000e+00 : f32
    %26 = vector.broadcast %cst_17 : f32 to vector<8x16xf32>
    %27 = arith.cmpf ogt, %25, %26 : vector<8x16xf32>
    %cst_18 = arith.constant 0.00999999977 : f32
    %28 = vector.broadcast %cst_18 : f32 to vector<8x16xf32>
    %29 = arith.mulf %28, %25 : vector<8x16xf32>
    %30 = arith.select %27, %25, %29 : vector<8x16xi1>, vector<8x16xf32>
    %31 = vector.broadcast %2 : vector<8x1xf32> to vector<8x16xf32>
    %32 = arith.mulf %30, %31 : vector<8x16xf32>
    %33 = vector.broadcast %3 : vector<8x1xf32> to vector<8x16xf32>
    %34 = arith.addf %32, %33 : vector<8x16xf32>
    %c1_19 = arith.constant 1 : index
    %c0_20 = arith.constant 0 : index
    %c0_21 = arith.constant 0 : index
    %35 = vector.load %arg5[%c1_19, %c0_20, %c0_21] : memref<2x8x16xf32, #tpu.memory_space<vmem>>, vector<1x8x16xf32>
    %36 = vector.shape_cast %35 : vector<1x8x16xf32> to vector<8x16xf32>
    %37 = vector.shape_cast %34 : vector<8x16xf32> to vector<1x8x16xf32>
    tpu.vector_store %arg5[%c1_19, %c0_20, %c0_21], %37 {strides = array<i32>} : memref<2x8x16xf32, #tpu.memory_space<vmem>>, vector<1x8x16xf32>,
    return
  }
  func.func @transform_0(%arg0: i32, %arg1: i32) -> (i32, i32, i32) {
    %c0_i32 = arith.constant 0 : i32
    %c0_i32_0 = arith.constant 0 : i32
    return %arg0, %c0_i32, %arg1 : i32, i32, i32
  }
  func.func @transform_1(%arg0: i32, %arg1: i32) -> (i32, i32) {
    %c0_i32 = arith.constant 0 : i32
    %c0_i32_0 = arith.constant 0 : i32
    %c0_i32_1 = arith.constant 0 : i32
    return %c0_i32, %c0_i32_0 : i32, i32
  }
  func.func @transform_2(%arg0: i32, %arg1: i32) -> (i32, i32) {
    %c0_i32 = arith.constant 0 : i32
    %c0_i32_0 = arith.constant 0 : i32
    %c0_i32_1 = arith.constant 0 : i32
    return %c0_i32, %c0_i32_0 : i32, i32
  }
  func.func @transform_3(%arg0: i32, %arg1: i32) -> (i32, i32, i32) {
    %c0_i32 = arith.constant 0 : i32
    %c0_i32_0 = arith.constant 0 : i32
    return %arg0, %c0_i32, %arg1 : i32, i32, i32
  }
}

</mosaic_0001>

<bundles_post_ra>
// kernel: conv_block_forward.2
= control target key start
LH: loop header
LB: loop body
LE: loop exit
PB: predicated region body
PF: predicated region fallthrough
CT: control target
= control target key end

     0   :  { %vm33_vm0 = vcmask 1043456   ;;  %vm29_vm1 = vcmask 31744   ;;  %v130_v3 = vmov 0   ;;  %vm18_vm2 = vcmask 130048   ;;  %s178_s0 = inlined_call_operand.vmem [shape: f32[2,4,16], index: 0, kind: input, shape index: {}]   ;;  %s179_s1 = inlined_call_operand.vmem [shape: f32[8,4], index: 1, kind: input, shape index: {}]   ;;  %s180_s2 = inlined_call_operand.vmem [shape: f32[8,1], index: 2, kind: input, shape index: {}]   ;;  %s181_s3 = inlined_call_operand.vmem [shape: f32[1,8,2], index: 3, kind: output, shape index: {}]  }
   0x1   :  { %v23_v0 = vld [vmem:[%s178_s0] sm:$0xf]  ;;  %v124_v1 = vld [vmem:[%s178_s0 + $0x4] sm:$0xf]  ;;  %129 = vset.pattern.permute.xlu0 %v130_v3  ;;  %v131_v5 = vmov 0.0   ;;  %vm110_vm5 = vcmask 7168  }
   0x2   :  { %v21_v2 = vld [vmem:[%s179_s1] sm:$0xff]  ;;  %122 = vmatpush.msk.msra.mxu0 %vm33_vm0, %v23_v0  ;;  %125 = vmatpush.msk.msra.mxu1 %vm33_vm0, %v124_v1  ;;  %19 = vst.msk [vmem:[#allocation2] sm:$0xff] %vm18_vm2, %v131_v5  ;;  %vm116_vm6 = vcmask 15368  }
   0x3   :  { %v22_v4 = vld [vmem:[%s180_s2] sm:$0xff]  ;;  %123 = vmatmul.msk.f32.vlgmr.msra.gmra.mxu0 %vm29_vm1, %v21_v2  ;;  %126 = vmatmul.msk.f32.vlgmr.msra.gmra.mxu1 %vm29_vm1, %v21_v2  ;;  %20 = vst.msk [vmem:[#allocation3] sm:$0xff] %vm18_vm2, %v131_v5 }
   0x4   :  { %26 = vperm.xlu0 %129, %v22_v4  }
   0x9   :  { %v60_v11 = vld [vmem:[#allocation2] sm:$0xff] }
   0xa   :  { %v64_v13 = vld [vmem:[#allocation3] sm:$0xff] }
  0x76   :  { %v27_v6 = vpop.permute.xlu0 %26 }
  0x80   :  { %v54_v7 = vpop.f32.mrf.mxu0  ;;  %v90_v9 = vpop.f32.mrf.mxu1 }
  0x81   :  { %v55_v8 = vadd.f32 %v54_v7, %v27_v6  ;;  %v91_v14 = vadd.f32 %v90_v9, %v27_v6 }
  0x83   :  { %vm57_vm3 = vcmp.gt.f32.partialorder %v55_v8, 0.0  ;;  %v58_v10 = vmul.f32 0.01, %v55_v8  ;;  %v94_v18 = vmul.f32 0.01, %v91_v14  ;;  %vm93_vm4 = vcmp.gt.f32.partialorder %v91_v14, 0.0 }
  0x85   :  { %v59_v12 = vsel %vm57_vm3, %v55_v8, %v58_v10  ;;  %v95_v19 = vsel %vm93_vm4, %v91_v14, %v94_v18 }
  0x86   :  { %v61_v15 = vadd.f32 %v60_v11, %v59_v12  ;;  %v65_v16 = vmul.f32 %v59_v12, %v59_v12  ;;  %v100_v22 = vmul.f32 %v95_v19, %v95_v19 }
  0x88   :  { %63 = vst.msk [vmem:[#allocation2] sm:$0xff] %vm18_vm2, %v61_v15  ;;  %v66_v17 = vadd.f32 %v65_v16, %v64_v13 }
  0x8a   :  { %67 = vst.msk [vmem:[#allocation3] sm:$0xff] %vm18_vm2, %v66_v17 }
  0x8f   :  { %v96_v20 = vld [vmem:[#allocation2] sm:$0xff] }
  0x90   :  { %v97_v21 = vadd.f32 %v96_v20, %v95_v19 }
  0x91   :  { %v99_v23 = vld [vmem:[#allocation3] sm:$0xff] }
  0x92   :  { %98 = vst.msk [vmem:[#allocation2] sm:$0xff] %vm18_vm2, %v97_v21  ;;  %v101_v24 = vadd.f32 %v100_v22, %v99_v23 }
  0x94   :  { %102 = vst.msk [vmem:[#allocation3] sm:$0xff] %vm18_vm2, %v101_v24 }
  0x99   :  { %v106_v25 = vld [vmem:[#allocation2] sm:$0xff] }
  0x9a   :  { %v107_v26 = vsel %vm18_vm2, %v106_v25, 0.0 }
  0x9b   :  { %108 = vadd.xlane.f32.xlu0 %v107_v26  ;;  %v112_v27 = vld [vmem:[#allocation3] sm:$0xff] }
  0x9c   :  { %v113_v28 = vsel %vm18_vm2, %v112_v27, 0.0 }
  0x9d   :  { %114 = vadd.xlane.f32.xlu1 %v113_v28 }
 0x10e   :  { %v109_v29 = vpop.xlane.xlu0 %108 }
 0x10f   :  { %111 = vst.msk [vmem:[%s181_s3] sm:$0xff] %vm110_vm5, %v109_v29 }
 0x110   :  { %v115_v30 = vpop.xlane.xlu1 %114 }
 0x111   :  { %117 = vst.msk [vmem:[%s181_s3] sm:$0xff] %vm116_vm6, %v115_v30 }

// kernel: conv_block_forward.3
= control target key start
LH: loop header
LB: loop body
LE: loop exit
PB: predicated region body
PF: predicated region fallthrough
CT: control target
= control target key end

     0   :  { %vm27_vm0 = vcmask 1043456   ;;  %vm23_vm1 = vcmask 31744   ;;  %s198_s0 = inlined_call_operand.vmem [shape: f32[2,4,16], index: 0, kind: input, shape index: {}]   ;;  %s199_s1 = inlined_call_operand.vmem [shape: f32[8,4], index: 1, kind: input, shape index: {}]   ;;  %s200_s2 = inlined_call_operand.vmem [shape: f32[8,3], index: 2, kind: input, shape index: {}]   ;;  %s201_s3 = inlined_call_operand.hbm [shape: f32[2,8,16], index: 3, kind: output, shape index: {}]  }
   0x1   :  { %v17_v0 = vld [vmem:[%s198_s0] sm:$0xf]  ;;  %v118_v1 = vld [vmem:[%s198_s0 + $0x4] sm:$0xf] }
   0x2   :  { %v15_v2 = vld [vmem:[%s199_s1] sm:$0xff]  ;;  %116 = vmatpush.msk.msra.mxu0 %vm27_vm0, %v17_v0  ;;  %119 = vmatpush.msk.msra.mxu1 %vm27_vm0, %v118_v1 }
   0x3   :  { %v16_v3 = vld [vmem:[%s200_s2] sm:$0xff]  ;;  %117 = vmatmul.msk.f32.vlgmr.msra.gmra.mxu0 %vm23_vm1, %v15_v2  ;;  %120 = vmatmul.msk.f32.vlgmr.msra.gmra.mxu1 %vm23_vm1, %v15_v2 }
   0x4   :  { %8 = vsyncpa [#allocation3], 0  ;;  %v157_v4 = vmov 0   ;;  %v158_v5 = vmov 2   ;;  %v159_v6 = vmov 1   ;;  %s160_s0 = smov [#allocation2]  }
   0x5   :  { %127 = vset.pattern.permute.xlu0 %v157_v4  ;;  %129 = vset.pattern.permute.xlu1 %v158_v5  ;;  %s102_s1 = sshll.u32 %s160_s0, 4  ;;  %s104_s21 = sshll.u32 %s201_s3, 4  ;;  %vm64_vm4 = vcmask 130048   ;;  %s103_s1 = int_to_ptr.vmem [resolvable:$true] %s102_s1  ;;  %s105_s21 = int_to_ptr.hbm [resolvable:$true] %s104_s21 }
   0x6   :  { %20 = vperm.xlu0 %127, %v16_v3   ;;  %60 = vperm.xlu1 %129, %v16_v3   ;;  %s161_s22 = smov 128   ;;  %s162_s23 = smov 8  }
   0xe   :  { %128 = vset.pattern.permute.xlu0 %v159_v6 }
   0xf   :  { %55 = vperm.xlu0 %128, %v16_v3  }
  0x17   :  { %130 = vset.pattern.permute.xlu0 %v158_v5 }
  0x78   :  { %v21_v7 = vpop.permute.xlu0 %20  ;;  %v61_v17 = vpop.permute.xlu1 %60 }
  0x80   :  { %v48_v8 = vpop.f32.mrf.mxu0  ;;  %v88_v9 = vpop.f32.mrf.mxu1 }
  0x81   :  { %v49_v10 = vadd.f32 %v48_v8, %v21_v7  ;;  %v89_v11 = vadd.f32 %v88_v9, %v21_v7  ;;  %v56_v14 = vpop.permute.xlu0 %55 }
  0x83   :  { %v52_v12 = vmul.f32 0.01, %v49_v10  ;;  %v92_v13 = vmul.f32 0.01, %v89_v11  ;;  %vm51_vm2 = vcmp.gt.f32.partialorder %v49_v10, 0.0  ;;  %vm91_vm3 = vcmp.gt.f32.partialorder %v89_v11, 0.0 }
  0x85   :  { %v53_v15 = vsel %vm51_vm2, %v49_v10, %v52_v12  ;;  %v93_v16 = vsel %vm91_vm3, %v89_v11, %v92_v13 }
  0x86   :  { %v58_v18 = vmul.f32 %v56_v14, %v53_v15  ;;  %v94_v19 = vmul.f32 %v93_v16, %v56_v14 }
  0x88   :  { %v63_v20 = vadd.f32 %v61_v17, %v58_v18  ;;  %v95_v21 = vadd.f32 %v94_v19, %v61_v17 }
  0x8a   :  { %65 = vst.msk [vmem:[#allocation2] sm:$0xff] %vm64_vm4, %v63_v20 }
  0x8b   :  { %97 = vst.msk [vmem:[#allocation2 + $0x8] sm:$0xff] %vm64_vm4, %v95_v21 }
  0x8c   :  { %110 = dma.vmem_to_hbm [thread:$0]  %s103_s1, 256, %s105_s21, [#allocation3], %s161_s22, %s161_s22, %s162_s23  }
  0x8d   :  { %155 = dma.done.wait [#allocation3], 256  }
  0x8e   :  { %156 = vsyncadd [#allocation3], 4294967040 }
  0x8f   :  { %115 = vsyncpa [#allocation3], 1 }

</bundles_post_ra>
